<compile_context>
chip_gen: v7x
topology: tpu7x:2x2x1
jax: 0.10.0
libtpu: 0.0.40
codegen_flags: <defaults>
</compile_context>

<pallas_src>
import jax
import jax.numpy as jnp
import numpy as np
from jax.experimental import pallas as pl
from jax.experimental.pallas import tpu as pltpu

EPS = 1e-5
NUM_BN_LAYERS = 5


def valuenet_kernel(x_ref, w_ref, vecs_ref, o_ref):
    """ValueNet forward.

    x_ref:    (B, H)    bf16  state zero-padded from (B, C) to (B, H)
    w_ref:    (5, H, H) bf16  Linear weights pre-transposed to (in, out); layer 0 is
                              zero-padded from (C, H). Linear biases dropped (cancelled
                              exactly by train-mode BN mean subtraction).
    vecs_ref: (12, H)   f32   rows 0..4 = BN gamma, rows 5..9 = BN beta,
                              row 10 = last-layer weight (wlast^T), row 11 = blast (bcast)
    o_ref:    (B, 1)    f32
    """
    h = x_ref[...]                                        # bf16 (B, H)
    a = None
    for layer in range(NUM_BN_LAYERS):                    # static unroll; uniform layers
        # MXU matmul: bf16 operands, f32 accumulation.
        z = jnp.dot(h, w_ref[layer], preferred_element_type=jnp.float32)

        # Train-mode BatchNorm (biased batch stats, centered two-pass variance) + Tanh,
        # all in f32. Per-layer (1, H) vectors are read directly from the VMEM ref.
        g = vecs_ref[layer:layer + 1, :]                  # (1, H) gamma
        b = vecs_ref[5 + layer:6 + layer, :]              # (1, H) beta
        mean = jnp.mean(z, axis=0, keepdims=True)         # (1, H)
        c = z - mean                                      # centered
        var = jnp.mean(c * c, axis=0, keepdims=True)      # (1, H)
        a = jnp.tanh(c * (g * jax.lax.rsqrt(var + EPS)) + b)   # f32 (B, H)
        h = a.astype(jnp.bfloat16)                        # bf16 operand for next matmul

    # Final Linear(H -> 1): VPU multiply + lane reduction (kept off the MXU).
    wlast = vecs_ref[10:11, :]                            # (1, H)
    blast_row = vecs_ref[11:12, :]                        # (1, H), all lanes == blast
    o_ref[...] = jnp.sum(a * wlast, axis=-1, keepdims=True) + blast_row[:, 0:1]


def pack_params(params):
    """One-time packing, hoisted out of the per-call forward path.

    * drop Linear biases (cancelled exactly by train-mode BN mean subtraction),
    * zero-pad w0 (C,H) -> (H,H) and stack all 5 Linear weights into one (5,H,H) bf16 array,
    * pack gamma/beta/wlast/blast into one (12,H) f32 array.
    """
    (w0, b0, wmid, bmid, gamma, beta, wlast, blast) = params
    C, H = w0.shape
    w0_pad = jnp.zeros((H, H), jnp.float32).at[:C, :].set(w0)
    weights = jnp.concatenate([w0_pad[None], wmid], axis=0).astype(jnp.bfloat16)  # (5,H,H)
    vecs = jnp.concatenate(
        [
            gamma.reshape(5, H),                           # rows 0..4
            beta.reshape(5, H),                            # rows 5..9
            wlast.reshape(1, H),                           # row 10: wlast^T
            jnp.full((1, H), blast[0, 0], jnp.float32),    # row 11: blast (broadcast)
        ],
        axis=0,
    )                                                      # (12, H) f32
    return weights, vecs


@jax.jit
def value_net_forward(state, weights, vecs):
    """state: (B, C) f32; weights: (5, H, H) bf16; vecs: (12, H) f32.  Returns (B,) f32."""
    B, C = state.shape
    H = weights.shape[-1]
    assert B >= 2, "train-mode BatchNorm1d needs batch size >= 2"
    # Zero-pad state to (B, H); paired with zero-padded w0 rows this is an exact identity.
    x_pad = jnp.pad(state.astype(jnp.bfloat16), ((0, 0), (0, H - C)))

    out = pl.pallas_call(
        valuenet_kernel,
        out_shape=jax.ShapeDtypeStruct((B, 1), jnp.float32),
        in_specs=[pl.BlockSpec(memory_space=pltpu.MemorySpace.VMEM)] * 3,
        out_specs=pl.BlockSpec(memory_space=pltpu.MemorySpace.VMEM),
    )(x_pad, weights, vecs)
    return out[:, 0]  # squeeze(-1)


def init_params(key, state_channels):
    """Deterministic synthetic init (PyTorch-style uniform(-1/sqrt(fan_in), ...))."""
    C = state_channels
    H = 2 * C
    ks = jax.random.split(key, 16)

    def lin(kw, kb, fan_in, fan_out):
        bound = 1.0 / np.sqrt(fan_in)
        w = jax.random.uniform(kw, (fan_in, fan_out), jnp.float32, -bound, bound)
        b = jax.random.uniform(kb, (1, fan_out), jnp.float32, -bound, bound)
        return w, b

    w0, b0 = lin(ks[0], ks[1], C, H)

    wmid, bmid = [], []
    for i in range(4):
        w, b = lin(ks[2 + 2 * i], ks[3 + 2 * i], H, H)
        wmid.append(w)
        bmid.append(b[None])
    wmid = jnp.stack(wmid)            # (4, H, H)
    bmid = jnp.concatenate(bmid, 0)   # (4, 1, H)

    gamma = 1.0 + 0.1 * jax.random.normal(ks[10], (5, 1, H), jnp.float32)
    beta = 0.1 * jax.random.normal(ks[11], (5, 1, H), jnp.float32)

    wlast, blast = lin(ks[12], ks[13], H, 1)  # (H, 1), (1, 1)

    return (w0, b0, wmid, bmid, gamma, beta, wlast, blast)


def value_net_reference(state, params, matmul_dtype=jnp.float32):
    """Pure-JAX reference of the PyTorch forward (train-mode BN, WITH Linear biases).

    matmul_dtype=jnp.bfloat16 mirrors the kernel's mixed precision (bf16 matmul operands,
    f32 accumulation and BN/tanh math) for a tight apples-to-apples comparison.
    """
    (w0, b0, wmid, bmid, gamma, beta, wlast, blast) = params

    def mm(a, b):
        return jnp.dot(a.astype(matmul_dtype), b.astype(matmul_dtype),
                       preferred_element_type=jnp.float32)

    def bn_tanh(h, g, b):
        mean = jnp.mean(h, axis=0, keepdims=True)
        var = jnp.mean((h - mean) ** 2, axis=0, keepdims=True)
        return jnp.tanh((h - mean) / jnp.sqrt(var + EPS) * g + b)

    h = bn_tanh(mm(state, w0) + b0, gamma[0], beta[0])
    for i in range(4):
        h = bn_tanh(mm(h, wmid[i]) + bmid[i], gamma[i + 1], beta[i + 1])
    # Final layer is f32 in the kernel as well (VPU multiply + lane reduce).
    return (h @ wlast + blast)[:, 0]


if __name__ == "__main__":
    B = 8                 # batch
    state_channels = 16   # C  (hidden = 2C = 32)

    key = jax.random.PRNGKey(0)
    k_x, k_p = jax.random.split(key)
    state = jax.random.normal(k_x, (B, state_channels), jnp.float32)
    params = init_params(k_p, state_channels)

    # Packing is hoisted out of the forward path: done once here, reused per call.
    weights, vecs = pack_params(params)

    out = value_net_forward(state, weights, vecs)
    out = jax.block_until_ready(out)
    assert out.shape == (B,)

    # Tight check vs. a reference that mirrors the kernel's precision choices
    # (bf16 matmul operands, f32 BN/tanh): validates structure and BN math.
    ref_mirror = value_net_reference(state, params, matmul_dtype=jnp.bfloat16)
    np.testing.assert_allclose(np.asarray(out), np.asarray(ref_mirror), rtol=1e-3, atol=1e-3)

    # Loose check vs. the exact f32 PyTorch-semantics reference: bounds the bf16 drift.
    ref_f32 = value_net_reference(state, params)
    np.testing.assert_allclose(np.asarray(out), np.asarray(ref_f32), rtol=5e-2, atol=2e-1)

    print("KERNEL_OK")
</pallas_src>

<mosaic_0001>
module attributes {stable_mosaic.version = 11 : i64} {
  func.func @valuenet_kernel(%arg0: memref<8x32xbf16, #tpu.memory_space<vmem>>, %arg1: memref<5x32x32xbf16, #tpu.memory_space<vmem>>, %arg2: memref<12x32xf32, #tpu.memory_space<vmem>>, %arg3: memref<8x1xf32, #tpu.memory_space<vmem>>) attributes {dimension_semantics = [], scalar_prefetch = 0 : i64, scratch_operands = 0 : i64, tpu.core_type = #tpu.core_type<tc>} {
    %c0 = arith.constant 0 : index
    %c0_0 = arith.constant 0 : index
    %0 = vector.load %arg0[%c0, %c0_0] : memref<8x32xbf16, #tpu.memory_space<vmem>>, vector<8x32xbf16>
    %c0_1 = arith.constant 0 : index
    %c0_2 = arith.constant 0 : index
    %c0_3 = arith.constant 0 : index
    %1 = vector.load %arg1[%c0_1, %c0_2, %c0_3] : memref<5x32x32xbf16, #tpu.memory_space<vmem>>, vector<1x32x32xbf16>
    %2 = vector.shape_cast %1 : vector<1x32x32xbf16> to vector<32x32xbf16>
    %cst = arith.constant dense<0.000000e+00> : vector<8x32xf32>
    %3 = tpu.matmul %0, %2, %cst {dimension_numbers = #tpu.dot_dimension_numbers<[1], [0], [0], [1], [0, 0, 1, 1], [], []>} : vector<8x32xbf16>, vector<32x32xbf16>, vector<8x32xf32> -> vector<8x32xf32>
    %c0_4 = arith.constant 0 : index
    %c0_5 = arith.constant 0 : index
    %4 = vector.load %arg2[%c0_4, %c0_5] : memref<12x32xf32, #tpu.memory_space<vmem>>, vector<1x32xf32>
    %c5 = arith.constant 5 : index
    %c0_6 = arith.constant 0 : index
    %5 = vector.load %arg2[%c5, %c0_6] : memref<12x32xf32, #tpu.memory_space<vmem>>, vector<1x32xf32>
    %cst_7 = arith.constant dense<0.000000e+00> : vector<32xf32>
    %6 = vector.multi_reduction <add>, %3, %cst_7 [0] : vector<8x32xf32> to vector<32xf32>
    %7 = vector.shape_cast %6 : vector<32xf32> to vector<1x32xf32>
    %cst_8 = arith.constant 8.000000e+00 : f32
    %8 = vector.broadcast %cst_8 : f32 to vector<1x32xf32>
    %9 = arith.divf %7, %8 : vector<1x32xf32>
    %10 = vector.broadcast %9 : vector<1x32xf32> to vector<8x32xf32>
    %11 = arith.subf %3, %10 : vector<8x32xf32>
    %12 = arith.mulf %11, %11 : vector<8x32xf32>
    %cst_9 = arith.constant dense<0.000000e+00> : vector<32xf32>
    %13 = vector.multi_reduction <add>, %12, %cst_9 [0] : vector<8x32xf32> to vector<32xf32>
    %14 = vector.shape_cast %13 : vector<32xf32> to vector<1x32xf32>
    %cst_10 = arith.constant 8.000000e+00 : f32
    %15 = vector.broadcast %cst_10 : f32 to vector<1x32xf32>
    %16 = arith.divf %14, %15 : vector<1x32xf32>
    %cst_11 = arith.constant 9.99999974E-6 : f32
    %17 = vector.broadcast %cst_11 : f32 to vector<1x32xf32>
    %18 = arith.addf %16, %17 : vector<1x32xf32>
    %19 = math.rsqrt %18 : vector<1x32xf32>
    %20 = arith.mulf %4, %19 : vector<1x32xf32>
    %21 = vector.broadcast %20 : vector<1x32xf32> to vector<8x32xf32>
    %22 = arith.mulf %11, %21 : vector<8x32xf32>
    %23 = vector.broadcast %5 : vector<1x32xf32> to vector<8x32xf32>
    %24 = arith.addf %22, %23 : vector<8x32xf32>
    %25 = math.tanh %24 : vector<8x32xf32>
    %26 = arith.truncf %25 : vector<8x32xf32> to vector<8x32xbf16>
    %c1 = arith.constant 1 : index
    %c0_12 = arith.constant 0 : index
    %c0_13 = arith.constant 0 : index
    %27 = vector.load %arg1[%c1, %c0_12, %c0_13] : memref<5x32x32xbf16, #tpu.memory_space<vmem>>, vector<1x32x32xbf16>
    %28 = vector.shape_cast %27 : vector<1x32x32xbf16> to vector<32x32xbf16>
    %cst_14 = arith.constant dense<0.000000e+00> : vector<8x32xf32>
    %29 = tpu.matmul %26, %28, %cst_14 {dimension_numbers = #tpu.dot_dimension_numbers<[1], [0], [0], [1], [0, 0, 1, 1], [], []>} : vector<8x32xbf16>, vector<32x32xbf16>, vector<8x32xf32> -> vector<8x32xf32>
    %c1_15 = arith.constant 1 : index
    %c0_16 = arith.constant 0 : index
    %30 = vector.load %arg2[%c1_15, %c0_16] : memref<12x32xf32, #tpu.memory_space<vmem>>, vector<1x32xf32>
    %c6 = arith.constant 6 : index
    %c0_17 = arith.constant 0 : index
    %31 = vector.load %arg2[%c6, %c0_17] : memref<12x32xf32, #tpu.memory_space<vmem>>, vector<1x32xf32>
    %cst_18 = arith.constant dense<0.000000e+00> : vector<32xf32>
    %32 = vector.multi_reduction <add>, %29, %cst_18 [0] : vector<8x32xf32> to vector<32xf32>
    %33 = vector.shape_cast %32 : vector<32xf32> to vector<1x32xf32>
    %cst_19 = arith.constant 8.000000e+00 : f32
    %34 = vector.broadcast %cst_19 : f32 to vector<1x32xf32>
    %35 = arith.divf %33, %34 : vector<1x32xf32>
    %36 = vector.broadcast %35 : vector<1x32xf32> to vector<8x32xf32>
    %37 = arith.subf %29, %36 : vector<8x32xf32>
    %38 = arith.mulf %37, %37 : vector<8x32xf32>
    %cst_20 = arith.constant dense<0.000000e+00> : vector<32xf32>
    %39 = vector.multi_reduction <add>, %38, %cst_20 [0] : vector<8x32xf32> to vector<32xf32>
    %40 = vector.shape_cast %39 : vector<32xf32> to vector<1x32xf32>
    %cst_21 = arith.constant 8.000000e+00 : f32
    %41 = vector.broadcast %cst_21 : f32 to vector<1x32xf32>
    %42 = arith.divf %40, %41 : vector<1x32xf32>
    %cst_22 = arith.constant 9.99999974E-6 : f32
    %43 = vector.broadcast %cst_22 : f32 to vector<1x32xf32>
    %44 = arith.addf %42, %43 : vector<1x32xf32>
    %45 = math.rsqrt %44 : vector<1x32xf32>
    %46 = arith.mulf %30, %45 : vector<1x32xf32>
    %47 = vector.broadcast %46 : vector<1x32xf32> to vector<8x32xf32>
    %48 = arith.mulf %37, %47 : vector<8x32xf32>
    %49 = vector.broadcast %31 : vector<1x32xf32> to vector<8x32xf32>
    %50 = arith.addf %48, %49 : vector<8x32xf32>
    %51 = math.tanh %50 : vector<8x32xf32>
    %52 = arith.truncf %51 : vector<8x32xf32> to vector<8x32xbf16>
    %c2 = arith.constant 2 : index
    %c0_23 = arith.constant 0 : index
    %c0_24 = arith.constant 0 : index
    %53 = vector.load %arg1[%c2, %c0_23, %c0_24] : memref<5x32x32xbf16, #tpu.memory_space<vmem>>, vector<1x32x32xbf16>
    %54 = vector.shape_cast %53 : vector<1x32x32xbf16> to vector<32x32xbf16>
    %cst_25 = arith.constant dense<0.000000e+00> : vector<8x32xf32>
    %55 = tpu.matmul %52, %54, %cst_25 {dimension_numbers = #tpu.dot_dimension_numbers<[1], [0], [0], [1], [0, 0, 1, 1], [], []>} : vector<8x32xbf16>, vector<32x32xbf16>, vector<8x32xf32> -> vector<8x32xf32>
    %c2_26 = arith.constant 2 : index
    %c0_27 = arith.constant 0 : index
    %56 = vector.load %arg2[%c2_26, %c0_27] : memref<12x32xf32, #tpu.memory_space<vmem>>, vector<1x32xf32>
    %c7 = arith.constant 7 : index
    %c0_28 = arith.constant 0 : index
    %57 = vector.load %arg2[%c7, %c0_28] : memref<12x32xf32, #tpu.memory_space<vmem>>, vector<1x32xf32>
    %cst_29 = arith.constant dense<0.000000e+00> : vector<32xf32>
    %58 = vector.multi_reduction <add>, %55, %cst_29 [0] : vector<8x32xf32> to vector<32xf32>
    %59 = vector.shape_cast %58 : vector<32xf32> to vector<1x32xf32>
    %cst_30 = arith.constant 8.000000e+00 : f32
    %60 = vector.broadcast %cst_30 : f32 to vector<1x32xf32>
    %61 = arith.divf %59, %60 : vector<1x32xf32>
    %62 = vector.broadcast %61 : vector<1x32xf32> to vector<8x32xf32>
    %63 = arith.subf %55, %62 : vector<8x32xf32>
    %64 = arith.mulf %63, %63 : vector<8x32xf32>
    %cst_31 = arith.constant dense<0.000000e+00> : vector<32xf32>
    %65 = vector.multi_reduction <add>, %64, %cst_31 [0] : vector<8x32xf32> to vector<32xf32>
    %66 = vector.shape_cast %65 : vector<32xf32> to vector<1x32xf32>
    %cst_32 = arith.constant 8.000000e+00 : f32
    %67 = vector.broadcast %cst_32 : f32 to vector<1x32xf32>
    %68 = arith.divf %66, %67 : vector<1x32xf32>
    %cst_33 = arith.constant 9.99999974E-6 : f32
    %69 = vector.broadcast %cst_33 : f32 to vector<1x32xf32>
    %70 = arith.addf %68, %69 : vector<1x32xf32>
    %71 = math.rsqrt %70 : vector<1x32xf32>
    %72 = arith.mulf %56, %71 : vector<1x32xf32>
    %73 = vector.broadcast %72 : vector<1x32xf32> to vector<8x32xf32>
    %74 = arith.mulf %63, %73 : vector<8x32xf32>
    %75 = vector.broadcast %57 : vector<1x32xf32> to vector<8x32xf32>
    %76 = arith.addf %74, %75 : vector<8x32xf32>
    %77 = math.tanh %76 : vector<8x32xf32>
    %78 = arith.truncf %77 : vector<8x32xf32> to vector<8x32xbf16>
    %c3 = arith.constant 3 : index
    %c0_34 = arith.constant 0 : index
    %c0_35 = arith.constant 0 : index
    %79 = vector.load %arg1[%c3, %c0_34, %c0_35] : memref<5x32x32xbf16, #tpu.memory_space<vmem>>, vector<1x32x32xbf16>
    %80 = vector.shape_cast %79 : vector<1x32x32xbf16> to vector<32x32xbf16>
    %cst_36 = arith.constant dense<0.000000e+00> : vector<8x32xf32>
    %81 = tpu.matmul %78, %80, %cst_36 {dimension_numbers = #tpu.dot_dimension_numbers<[1], [0], [0], [1], [0, 0, 1, 1], [], []>} : vector<8x32xbf16>, vector<32x32xbf16>, vector<8x32xf32> -> vector<8x32xf32>
    %c3_37 = arith.constant 3 : index
    %c0_38 = arith.constant 0 : index
    %82 = vector.load %arg2[%c3_37, %c0_38] : memref<12x32xf32, #tpu.memory_space<vmem>>, vector<1x32xf32>
    %c8 = arith.constant 8 : index
    %c0_39 = arith.constant 0 : index
    %83 = vector.load %arg2[%c8, %c0_39] : memref<12x32xf32, #tpu.memory_space<vmem>>, vector<1x32xf32>
    %cst_40 = arith.constant dense<0.000000e+00> : vector<32xf32>
    %84 = vector.multi_reduction <add>, %81, %cst_40 [0] : vector<8x32xf32> to vector<32xf32>
    %85 = vector.shape_cast %84 : vector<32xf32> to vector<1x32xf32>
    %cst_41 = arith.constant 8.000000e+00 : f32
    %86 = vector.broadcast %cst_41 : f32 to vector<1x32xf32>
    %87 = arith.divf %85, %86 : vector<1x32xf32>
    %88 = vector.broadcast %87 : vector<1x32xf32> to vector<8x32xf32>
    %89 = arith.subf %81, %88 : vector<8x32xf32>
    %90 = arith.mulf %89, %89 : vector<8x32xf32>
    %cst_42 = arith.constant dense<0.000000e+00> : vector<32xf32>
    %91 = vector.multi_reduction <add>, %90, %cst_42 [0] : vector<8x32xf32> to vector<32xf32>
    %92 = vector.shape_cast %91 : vector<32xf32> to vector<1x32xf32>
    %cst_43 = arith.constant 8.000000e+00 : f32
    %93 = vector.broadcast %cst_43 : f32 to vector<1x32xf32>
    %94 = arith.divf %92, %93 : vector<1x32xf32>
    %cst_44 = arith.constant 9.99999974E-6 : f32
    %95 = vector.broadcast %cst_44 : f32 to vector<1x32xf32>
    %96 = arith.addf %94, %95 : vector<1x32xf32>
    %97 = math.rsqrt %96 : vector<1x32xf32>
    %98 = arith.mulf %82, %97 : vector<1x32xf32>
    %99 = vector.broadcast %98 : vector<1x32xf32> to vector<8x32xf32>
    %100 = arith.mulf %89, %99 : vector<8x32xf32>
    %101 = vector.broadcast %83 : vector<1x32xf32> to vector<8x32xf32>
    %102 = arith.addf %100, %101 : vector<8x32xf32>
    %103 = math.tanh %102 : vector<8x32xf32>
    %104 = arith.truncf %103 : vector<8x32xf32> to vector<8x32xbf16>
    %c4 = arith.constant 4 : index
    %c0_45 = arith.constant 0 : index
    %c0_46 = arith.constant 0 : index
    %105 = vector.load %arg1[%c4, %c0_45, %c0_46] : memref<5x32x32xbf16, #tpu.memory_space<vmem>>, vector<1x32x32xbf16>
    %106 = vector.shape_cast %105 : vector<1x32x32xbf16> to vector<32x32xbf16>
    %cst_47 = arith.constant dense<0.000000e+00> : vector<8x32xf32>
    %107 = tpu.matmul %104, %106, %cst_47 {dimension_numbers = #tpu.dot_dimension_numbers<[1], [0], [0], [1], [0, 0, 1, 1], [], []>} : vector<8x32xbf16>, vector<32x32xbf16>, vector<8x32xf32> -> vector<8x32xf32>
    %c4_48 = arith.constant 4 : index
    %c0_49 = arith.constant 0 : index
    %108 = vector.load %arg2[%c4_48, %c0_49] : memref<12x32xf32, #tpu.memory_space<vmem>>, vector<1x32xf32>
    %c9 = arith.constant 9 : index
    %c0_50 = arith.constant 0 : index
    %109 = vector.load %arg2[%c9, %c0_50] : memref<12x32xf32, #tpu.memory_space<vmem>>, vector<1x32xf32>
    %cst_51 = arith.constant dense<0.000000e+00> : vector<32xf32>
    %110 = vector.multi_reduction <add>, %107, %cst_51 [0] : vector<8x32xf32> to vector<32xf32>
    %111 = vector.shape_cast %110 : vector<32xf32> to vector<1x32xf32>
    %cst_52 = arith.constant 8.000000e+00 : f32
    %112 = vector.broadcast %cst_52 : f32 to vector<1x32xf32>
    %113 = arith.divf %111, %112 : vector<1x32xf32>
    %114 = vector.broadcast %113 : vector<1x32xf32> to vector<8x32xf32>
    %115 = arith.subf %107, %114 : vector<8x32xf32>
    %116 = arith.mulf %115, %115 : vector<8x32xf32>
    %cst_53 = arith.constant dense<0.000000e+00> : vector<32xf32>
    %117 = vector.multi_reduction <add>, %116, %cst_53 [0] : vector<8x32xf32> to vector<32xf32>
    %118 = vector.shape_cast %117 : vector<32xf32> to vector<1x32xf32>
    %cst_54 = arith.constant 8.000000e+00 : f32
    %119 = vector.broadcast %cst_54 : f32 to vector<1x32xf32>
    %120 = arith.divf %118, %119 : vector<1x32xf32>
    %cst_55 = arith.constant 9.99999974E-6 : f32
    %121 = vector.broadcast %cst_55 : f32 to vector<1x32xf32>
    %122 = arith.addf %120, %121 : vector<1x32xf32>
    %123 = math.rsqrt %122 : vector<1x32xf32>
    %124 = arith.mulf %108, %123 : vector<1x32xf32>
    %125 = vector.broadcast %124 : vector<1x32xf32> to vector<8x32xf32>
    %126 = arith.mulf %115, %125 : vector<8x32xf32>
    %127 = vector.broadcast %109 : vector<1x32xf32> to vector<8x32xf32>
    %128 = arith.addf %126, %127 : vector<8x32xf32>
    %129 = math.tanh %128 : vector<8x32xf32>
    %c10 = arith.constant 10 : index
    %c0_56 = arith.constant 0 : index
    %130 = vector.load %arg2[%c10, %c0_56] : memref<12x32xf32, #tpu.memory_space<vmem>>, vector<1x32xf32>
    %c11 = arith.constant 11 : index
    %c0_57 = arith.constant 0 : index
    %131 = vector.load %arg2[%c11, %c0_57] : memref<12x32xf32, #tpu.memory_space<vmem>>, vector<1x32xf32>
    %132 = vector.broadcast %130 : vector<1x32xf32> to vector<8x32xf32>
    %133 = arith.mulf %129, %132 : vector<8x32xf32>
    %cst_58 = arith.constant dense<0.000000e+00> : vector<8xf32>
    %134 = vector.multi_reduction <add>, %133, %cst_58 [1] : vector<8x32xf32> to vector<8xf32>
    %135 = vector.shape_cast %134 : vector<8xf32> to vector<8x1xf32>
    %136 = vector.extract_strided_slice %131 {offsets = [0, 0], sizes = [1, 1], strides = [1, 1]} : vector<1x32xf32> to vector<1x1xf32>
    %137 = vector.broadcast %136 : vector<1x1xf32> to vector<8x1xf32>
    %138 = arith.addf %135, %137 : vector<8x1xf32>
    %c0_59 = arith.constant 0 : index
    %c0_60 = arith.constant 0 : index
    %139 = vector.load %arg3[%c0_59, %c0_60] : memref<8x1xf32, #tpu.memory_space<vmem>>, vector<8x1xf32>
    tpu.vector_store %arg3[%c0_59, %c0_60], %138 {strides = array<i32>} : memref<8x1xf32, #tpu.memory_space<vmem>>, vector<8x1xf32>,
    return
  }
}

</mosaic_0001>

<bundles_post_ra>
// kernel: value_net_forward.1
= control target key start
LH: loop header
LB: loop body
LE: loop exit
PB: predicated region body
PF: predicated region fallthrough
CT: control target
= control target key end

     0   :  { %8 = vsyncpa [#allocation3], 0  ;;  %s663_s12 = smov [#allocation2]   ;;  %s785_s0 = inlined_call_operand.vmem [shape: bf16[8,32], index: 0, kind: input, shape index: {}]   ;;  %s786_s1 = inlined_call_operand.hbm [shape: bf16[5,32,32], index: 1, kind: input, shape index: {}]   ;;  %s787_s2 = inlined_call_operand.vmem [shape: f32[12,32], index: 2, kind: input, shape index: {}]   ;;  %s788_s3 = inlined_call_operand.vmem [shape: f32[8,1], index: 3, kind: output, shape index: {}]  }
   0x1   :  { %s16_s13 = sshll.u32 %s663_s12, 4  ;;  %s639_s16 = scalar_lea.hbm %s786_s1, 1280  ;;  %s17_s13 = int_to_ptr.vmem [resolvable:$true] %s16_s13 }
   0x2   :  { %p640_p0 = scmp.ne.s32.totalorder %s786_s1, %s639_s16  ;;  %p643_p1 = scmp.lt.u32.totalorder %s639_s16, %s786_s1 }
   0x4   :  { %p645_p2 = pnand %p643_p1, %p640_p0 }
   0x6   :  { %648 = shalt.err (!%p645_p2)
}
   0x7   :  { %s649_s21 = scalar_lea.vmem %s17_s13, 1280  ;;  %p654_p4 = scmp.lt.s32.totalorder %s17_s13, %s17_s13 }
   0x8   :  { %p650_p3 = scmp.ne.s32.totalorder %s17_s13, %s649_s21  ;;  %p655_p5 = scmp.lt.s32.totalorder %s649_s21, %s649_s21 }
   0xa   :  { %p656_p6 = por %p655_p5, %p654_p4 }
   0xc   :  { %p657_p7 = pnand %p656_p6, %p650_p3 }
   0xe   :  { %660 = shalt.err (!%p657_p7)
}
   0xf   :  { %s664_s22 = smov 64   ;;  %s665_s23 = smov 4  }
  0x10   :  { %22 = dma.hbm_to_vmem [thread:$0]  %s786_s1, 1280, %s17_s13, [#allocation3], %s664_s22, %s664_s22, %s665_s23  }
  0x11   :  { %661 = dma.done.wait [#allocation3], 1280  }
  0x12   :  { %662 = vsyncadd [#allocation3], 4294966016  ;;  %v666_v0 = vmov 0.0   ;;  %vm667_vm0 = vmmov 0   ;;  %v609_v1 = vld [vmem:[#allocation2] sm:$0xff]   ;;  %v610_v2 = vld [vmem:[#allocation2 + $0x8] sm:$0xff]   ;;  %v114_v29 = vlaneseq }
  0x13   :  { %564 = vmatprep.subr.bf16.mxu0 %v666_v0  ;;  %568 = vmatprep.mubr.msk.bf16.mxu0 %vm667_vm0, %v666_v0  ;;  %vm46_vm1 = vcmask 261120   ;;  %v29_v3 = vld [vmem:[%s785_s0] sm:$0xf]  ;;  %v612_v5 = vld [vmem:[#allocation2 + $0x18] sm:$0xff]   ;;  %v530_v36 = vld [vmem:[%s787_s2 + $0x5] ss:$0 sm:$0xff] }
  0x14   :  { %572 = vmatprep.subr.bf16.mxu1 %v666_v0  ;;  %576 = vmatprep.mubr.msk.bf16.mxu1 %vm667_vm0, %v666_v0  ;;  %v611_v4 = vld [vmem:[#allocation2 + $0x10] sm:$0xff]   ;;  %v115_v30 = vshrl.u32 %v114_v29, 7  ;;  %v613_v41 = vld [vmem:[#allocation2 + $0x20] sm:$0xff]   ;;  %v614_v42 = vld [vmem:[#allocation2 + $0x28] sm:$0xff]   ;;  %vm520_vm2 = vcmask 7168  }
  0x15   :  { %565 = vmatpush3.bf16.msra.mxu0 %v609_v1  ;;  %573 = vmatpush3.bf16.msra.mxu1 %v611_v4  ;;  %v90_v31 = vld [vmem:[%s787_s2] sm:$0x1] }
  0x16   :  { %566 = vmatprep.subr.bf16.mxu0 %v666_v0  ;;  %574 = vmatprep.subr.bf16.mxu1 %v666_v0  ;;  %v721_v32 = vsub.s32 0, %v115_v30 }
  0x19   :  { %567 = vmatpush3.bf16.msra.mxu0 %v610_v2  ;;  %575 = vmatpush3.bf16.msra.mxu1 %v612_v5 }
  0x1a   :  { %580 = vmatprep.subr.bf16.mxu0 %v666_v0  ;;  %588 = vmatprep.subr.bf16.mxu1 %v666_v0 }
  0x1c   :  { %569 = vmatmul.mubr.msk.bf16.vlgmr.msra.gmra.mrb[0].mxu0 %vm46_vm1, %v29_v3  ;;  %v186_v3 = vld [vmem:[%s787_s2 + $0x1] sm:$0x1] }
  0x1d   :  { %584 = vmatprep.mubr.msk.bf16.mxu0 %vm667_vm0, %v666_v0  ;;  %581 = vmatpush3.bf16.msra.mxu0 %v613_v41 }
  0x1e   :  { %582 = vmatprep.subr.bf16.mxu0 %v666_v0 }
  0x21   :  { %583 = vmatpush3.bf16.msra.mxu0 %v614_v42  ;;  %v538_v42 = vld [vmem:[%s787_s2 + $0x7] ss:$0 sm:$0xff] }
  0x22   :  { %596 = vmatprep.subr.bf16.mxu0 %v666_v0 }
  0xef   :  { %v84_v6 = vpop.f32.mrb[0].mxu0 }
  0xf0   :  { %v92_v7 = vsel %vm46_vm1, %v84_v6, 0.0  ;;  %v570_v8 = vpop.f32.mrb[1].mxu0 }
  0xf1   :  { %v93_v9 = vrot.slane %v92_v7, 4  ;;  %v87_v10 = vpop.f32.mrb[2].mxu0 }
  0xf2   :  { %v571_v11 = vpop.f32.mrb[3].mxu0 }
  0xf3   :  { %v94_v12 = vadd.f32 %v93_v9, %v92_v7  ;;  %v534_v7 = vld [vmem:[%s787_s2 + $0x6] ss:$0 sm:$0xff] }
  0xf5   :  { %v95_v13 = vrot.slane %v94_v12, 2 }
  0xf7   :  { %v96_v14 = vadd.f32 %v95_v13, %v94_v12  ;;  %v615_v12 = vld [vmem:[#allocation2 + $0x30] sm:$0xff]   ;;  %v616_v13 = vld [vmem:[#allocation2 + $0x38] sm:$0xff]  }
  0xf9   :  { %v97_v15 = vrot.slane %v96_v14, 1 }
  0xfb   :  { %v98_v16 = vadd.f32 %v97_v15, %v96_v14 }
  0xfd   :  { %v100_v17 = vmul.f32 0.125, %v98_v16 }
  0xff   :  { %v101_v18 = vsub.f32 %v84_v6, %v100_v17 }
 0x101   :  { %v102_v19 = vmul.f32 %v101_v18, %v101_v18 }
 0x103   :  { %v103_v20 = vsel %vm46_vm1, %v102_v19, 0.0 }
 0x104   :  { %v104_v21 = vrot.slane %v103_v20, 4 }
 0x106   :  { %v105_v22 = vadd.f32 %v104_v21, %v103_v20 }
 0x108   :  { %v106_v23 = vrot.slane %v105_v22, 2 }
 0x10a   :  { %v107_v24 = vadd.f32 %v106_v23, %v105_v22 }
 0x10c   :  { %v108_v25 = vrot.slane %v107_v24, 1 }
 0x10e   :  { %v109_v26 = vadd.f32 %v108_v25, %v107_v24 }
 0x110   :  { %v110_v27 = vmul.f32 0.125, %v109_v26 }
 0x112   :  { %v111_v28 = vadd.f32 1e-05, %v110_v27 }
 0x114   :  { %619 = vrsqrt.f32 %v111_v28 }
 0x11e   :  { %v620_v33 = vpop.eup %619 }
 0x11f   :  { %v113_v34 = vmul.f32 %v620_v33, %v90_v31 }
 0x121   :  { %v117_v35 = vrot.slane %v113_v34, %v721_v32 }
 0x123   :  { %v118_v37 = vmul.f32 %v117_v35, %v101_v18 }
 0x125   :  { %v123_v38 = vadd.f32 %v530_v36, %v118_v37 }
 0x127   :  { %621 = vtanh.f32 %v123_v38  ;;  %v281_v38 = vld [vmem:[%s787_s2 + $0x2] sm:$0x1] }
 0x131   :  { %v622_v39 = vpop.eup %621 }
 0x132   :  { %v125_v40 = vpack.c.bf16 %v622_v39, %v622_v39 }
 0x134   :  { %577 = vmatmul.mubr.msk.bf16.vlgmr.msra.gmra.mrb[0].mxu1 %vm46_vm1, %v125_v40 }
 0x135   :  { %592 = vmatprep.mubr.msk.bf16.mxu1 %vm667_vm0, %v666_v0  ;;  %589 = vmatpush3.bf16.msra.mxu1 %v615_v12  ;;  %v542_v12 = vld [vmem:[%s787_s2 + $0x8] ss:$0 sm:$0xff] }
 0x136   :  { %590 = vmatprep.subr.bf16.mxu1 %v666_v0 }
 0x139   :  { %591 = vmatpush3.bf16.msra.mxu1 %v616_v13 }
 0x207   :  { %v180_v43 = vpop.f32.mrb[0].mxu1 }
 0x208   :  { %v188_v44 = vsel %vm46_vm1, %v180_v43, 0.0  ;;  %v578_v45 = vpop.f32.mrb[1].mxu1 }
 0x209   :  { %v189_v46 = vrot.slane %v188_v44, 4  ;;  %v183_v47 = vpop.f32.mrb[2].mxu1 }
 0x20a   :  { %v579_v48 = vpop.f32.mrb[3].mxu1  ;;  %v617_v47 = vld [vmem:[#allocation2 + $0x40] sm:$0xff]  }
 0x20b   :  { %v190_v49 = vadd.f32 %v189_v46, %v188_v44  ;;  %v618_v48 = vld [vmem:[#allocation2 + $0x48] sm:$0xff]  }
 0x20d   :  { %v191_v50 = vrot.slane %v190_v49, 2 }
 0x20f   :  { %v192_v51 = vadd.f32 %v191_v50, %v190_v49 }
 0x211   :  { %v193_v52 = vrot.slane %v192_v51, 1 }
 0x213   :  { %v194_v53 = vadd.f32 %v193_v52, %v192_v51 }
 0x215   :  { %v195_v54 = vmul.f32 0.125, %v194_v53 }
 0x217   :  { %v196_v55 = vsub.f32 %v180_v43, %v195_v54 }
 0x219   :  { %v197_v56 = vmul.f32 %v196_v55, %v196_v55 }
 0x21b   :  { %v198_v57 = vsel %vm46_vm1, %v197_v56, 0.0 }
 0x21c   :  { %v199_v58 = vrot.slane %v198_v57, 4 }
 0x21e   :  { %v200_v59 = vadd.f32 %v199_v58, %v198_v57 }
 0x220   :  { %v201_v60 = vrot.slane %v200_v59, 2 }
 0x222   :  { %v202_v61 = vadd.f32 %v201_v60, %v200_v59 }
 0x224   :  { %v203_v62 = vrot.slane %v202_v61, 1 }
 0x226   :  { %v204_v63 = vadd.f32 %v203_v62, %v202_v61 }
 0x228   :  { %v205_v1 = vmul.f32 0.125, %v204_v63 }
 0x22a   :  { %v206_v2 = vadd.f32 1e-05, %v205_v1 }
 0x22c   :  { %623 = vrsqrt.f32 %v206_v2 }
 0x236   :  { %v624_v4 = vpop.eup %623 }
 0x237   :  { %v208_v5 = vmul.f32 %v624_v4, %v186_v3 }
 0x239   :  { %v212_v6 = vrot.slane %v208_v5, %v721_v32 }
 0x23b   :  { %v213_v8 = vmul.f32 %v212_v6, %v196_v55 }
 0x23d   :  { %v218_v9 = vadd.f32 %v534_v7, %v213_v8  ;;  %v376_v8 = vld [vmem:[%s787_s2 + $0x3] sm:$0x1] }
 0x23f   :  { %625 = vtanh.f32 %v218_v9 }
 0x249   :  { %v626_v10 = vpop.eup %625 }
 0x24a   :  { %v220_v11 = vpack.c.bf16 %v626_v10, %v626_v10 }
 0x24c   :  { %585 = vmatmul.mubr.msk.bf16.vlgmr.msra.gmra.mrb[4].mxu0 %vm46_vm1, %v220_v11 }
 0x24d   :  { %600 = vmatprep.mubr.msk.bf16.mxu0 %vm667_vm0, %v666_v0  ;;  %597 = vmatpush3.bf16.msra.mxu0 %v617_v47 }
 0x24e   :  { %598 = vmatprep.subr.bf16.mxu0 %v666_v0 }
 0x251   :  { %599 = vmatpush3.bf16.msra.mxu0 %v618_v48  ;;  %v547_v48 = vld [vmem:[%s787_s2 + $0xa] ss:$0 sm:$0xff] }
 0x31f   :  { %v275_v14 = vpop.f32.mrb[4].mxu0 }
 0x320   :  { %v283_v15 = vsel %vm46_vm1, %v275_v14, 0.0  ;;  %v586_v16 = vpop.f32.mrb[5].mxu0 }
 0x321   :  { %v284_v17 = vrot.slane %v283_v15, 4  ;;  %v278_v18 = vpop.f32.mrb[6].mxu0 }
 0x322   :  { %v587_v19 = vpop.f32.mrb[7].mxu0 }
 0x323   :  { %v285_v20 = vadd.f32 %v284_v17, %v283_v15 }
 0x325   :  { %v286_v21 = vrot.slane %v285_v20, 2 }
 0x327   :  { %v287_v22 = vadd.f32 %v286_v21, %v285_v20 }
 0x329   :  { %v288_v23 = vrot.slane %v287_v22, 1 }
 0x32b   :  { %v289_v24 = vadd.f32 %v288_v23, %v287_v22 }
 0x32d   :  { %v290_v25 = vmul.f32 0.125, %v289_v24 }
 0x32f   :  { %v291_v26 = vsub.f32 %v275_v14, %v290_v25 }
 0x331   :  { %v292_v27 = vmul.f32 %v291_v26, %v291_v26 }
 0x333   :  { %v293_v28 = vsel %vm46_vm1, %v292_v27, 0.0 }
 0x334   :  { %v294_v29 = vrot.slane %v293_v28, 4 }
 0x336   :  { %v295_v30 = vadd.f32 %v294_v29, %v293_v28 }
 0x338   :  { %v296_v31 = vrot.slane %v295_v30, 2 }
 0x33a   :  { %v297_v33 = vadd.f32 %v296_v31, %v295_v30 }
 0x33c   :  { %v298_v34 = vrot.slane %v297_v33, 1 }
 0x33e   :  { %v299_v35 = vadd.f32 %v298_v34, %v297_v33 }
 0x340   :  { %v300_v36 = vmul.f32 0.125, %v299_v35 }
 0x342   :  { %v301_v37 = vadd.f32 1e-05, %v300_v36 }
 0x344   :  { %627 = vrsqrt.f32 %v301_v37 }
 0x34e   :  { %v628_v39 = vpop.eup %627 }
 0x34f   :  { %v303_v40 = vmul.f32 %v628_v39, %v281_v38 }
 0x351   :  { %v307_v41 = vrot.slane %v303_v40, %v721_v32 }
 0x353   :  { %v308_v43 = vmul.f32 %v307_v41, %v291_v26  ;;  %v471_v41 = vld [vmem:[%s787_s2 + $0x4] sm:$0x1] }
 0x355   :  { %v313_v44 = vadd.f32 %v538_v42, %v308_v43 }
 0x357   :  { %629 = vtanh.f32 %v313_v44 }
 0x361   :  { %v630_v45 = vpop.eup %629 }
 0x362   :  { %v315_v46 = vpack.c.bf16 %v630_v45, %v630_v45  ;;  %v546_v45 = vld [vmem:[%s787_s2 + $0x9] ss:$0 sm:$0xff] }
 0x364   :  { %593 = vmatmul.mubr.msk.bf16.vlgmr.msra.gmra.mrb[4].mxu1 %vm46_vm1, %v315_v46 }
 0x437   :  { %v370_v49 = vpop.f32.mrb[4].mxu1 }
 0x438   :  { %v378_v50 = vsel %vm46_vm1, %v370_v49, 0.0  ;;  %v594_v51 = vpop.f32.mrb[5].mxu1 }
 0x439   :  { %v379_v52 = vrot.slane %v378_v50, 4  ;;  %v373_v53 = vpop.f32.mrb[6].mxu1 }
 0x43a   :  { %v595_v54 = vpop.f32.mrb[7].mxu1 }
 0x43b   :  { %v380_v55 = vadd.f32 %v379_v52, %v378_v50 }
 0x43d   :  { %v381_v56 = vrot.slane %v380_v55, 2 }
 0x43f   :  { %v382_v57 = vadd.f32 %v381_v56, %v380_v55 }
 0x441   :  { %v383_v58 = vrot.slane %v382_v57, 1 }
 0x443   :  { %v384_v59 = vadd.f32 %v383_v58, %v382_v57 }
 0x445   :  { %v385_v60 = vmul.f32 0.125, %v384_v59 }
 0x447   :  { %v386_v61 = vsub.f32 %v370_v49, %v385_v60 }
 0x449   :  { %v387_v62 = vmul.f32 %v386_v61, %v386_v61 }
 0x44b   :  { %v388_v63 = vsel %vm46_vm1, %v387_v62, 0.0 }
 0x44c   :  { %v389_v0 = vrot.slane %v388_v63, 4 }
 0x44e   :  { %v390_v1 = vadd.f32 %v389_v0, %v388_v63 }
 0x450   :  { %v391_v2 = vrot.slane %v390_v1, 2 }
 0x452   :  { %v392_v3 = vadd.f32 %v391_v2, %v390_v1 }
 0x454   :  { %v393_v4 = vrot.slane %v392_v3, 1 }
 0x456   :  { %v394_v5 = vadd.f32 %v393_v4, %v392_v3 }
 0x458   :  { %v395_v6 = vmul.f32 0.125, %v394_v5 }
 0x45a   :  { %v396_v7 = vadd.f32 1e-05, %v395_v6 }
 0x45c   :  { %631 = vrsqrt.f32 %v396_v7 }
 0x466   :  { %v632_v9 = vpop.eup %631 }
 0x467   :  { %v398_v10 = vmul.f32 %v632_v9, %v376_v8 }
 0x469   :  { %v402_v11 = vrot.slane %v398_v10, %v721_v32 }
 0x46b   :  { %v403_v13 = vmul.f32 %v402_v11, %v386_v61 }
 0x46d   :  { %v408_v14 = vadd.f32 %v542_v12, %v403_v13 }
 0x46f   :  { %633 = vtanh.f32 %v408_v14 }
 0x479   :  { %v634_v15 = vpop.eup %633 }
 0x47a   :  { %v410_v16 = vpack.c.bf16 %v634_v15, %v634_v15 }
 0x47c   :  { %601 = vmatmul.mubr.msk.bf16.vlgmr.msra.gmra.mrb[8].mxu0 %vm46_vm1, %v410_v16 }
 0x54f   :  { %v465_v17 = vpop.f32.mrb[8].mxu0 }
 0x550   :  { %v473_v18 = vsel %vm46_vm1, %v465_v17, 0.0  ;;  %v602_v19 = vpop.f32.mrb[9].mxu0 }
 0x551   :  { %v474_v20 = vrot.slane %v473_v18, 4  ;;  %v468_v21 = vpop.f32.mrb[10].mxu0 }
 0x552   :  { %v603_v22 = vpop.f32.mrb[11].mxu0 }
 0x553   :  { %v475_v23 = vadd.f32 %v474_v20, %v473_v18 }
 0x555   :  { %v476_v24 = vrot.slane %v475_v23, 2 }
 0x557   :  { %v477_v25 = vadd.f32 %v476_v24, %v475_v23 }
 0x559   :  { %v478_v26 = vrot.slane %v477_v25, 1 }
 0x55b   :  { %v479_v27 = vadd.f32 %v478_v26, %v477_v25 }
 0x55d   :  { %v480_v28 = vmul.f32 0.125, %v479_v27 }
 0x55f   :  { %v481_v29 = vsub.f32 %v465_v17, %v480_v28 }
 0x561   :  { %v482_v30 = vmul.f32 %v481_v29, %v481_v29 }
 0x563   :  { %v483_v31 = vsel %vm46_vm1, %v482_v30, 0.0 }
 0x564   :  { %v484_v33 = vrot.slane %v483_v31, 4 }
 0x566   :  { %v485_v34 = vadd.f32 %v484_v33, %v483_v31 }
 0x568   :  { %v486_v35 = vrot.slane %v485_v34, 2 }
 0x56a   :  { %v487_v36 = vadd.f32 %v486_v35, %v485_v34 }
 0x56c   :  { %v488_v37 = vrot.slane %v487_v36, 1 }
 0x56e   :  { %v489_v38 = vadd.f32 %v488_v37, %v487_v36 }
 0x570   :  { %v490_v39 = vmul.f32 0.125, %v489_v38 }
 0x572   :  { %v491_v40 = vadd.f32 1e-05, %v490_v39 }
 0x574   :  { %635 = vrsqrt.f32 %v491_v40 }
 0x57e   :  { %v636_v42 = vpop.eup %635 }
 0x57f   :  { %v493_v43 = vmul.f32 %v636_v42, %v471_v41 }
 0x581   :  { %v497_v44 = vrot.slane %v493_v43, %v721_v32  ;;  %v548_v32 = vld [vmem:[%s787_s2 + $0xb] ss:$0 sm:$0xff] }
 0x583   :  { %v498_v46 = vmul.f32 %v497_v44, %v481_v29 }
 0x585   :  { %v503_v47 = vadd.f32 %v546_v45, %v498_v46 }
 0x587   :  { %637 = vtanh.f32 %v503_v47 }
 0x591   :  { %v638_v49 = vpop.eup %637 }
 0x592   :  { %v511_v50 = vmul.f32 %v638_v49, %v547_v48 }
 0x594   :  { %v512_v51 = vsel %vm46_vm1, %v511_v50, 0.0 }
 0x595   :  { %513 = vadd.xlane.f32.xlu0 %v512_v51 }
 0x622   :  { %v514_v52 = vpop.xlane.xlu0 %513 }
 0x623   :  { %v519_v53 = vadd.f32 %v548_v32, %v514_v52 }
 0x625   :  { %521 = vst.msk [vmem:[%s788_s3] sm:$0xff] %vm520_vm2, %v519_v53 }
 0x626   :  { %526 = vsyncpa [#allocation3], 1 }

</bundles_post_ra>
